<compile_context>
chip_gen: v7x
topology: tpu7x:2x2x1
jax: 0.10.0
libtpu: 0.0.40
codegen_flags: <defaults>
</compile_context>

<pallas_src>
from functools import partial

import jax
import jax.numpy as jnp
from jax.experimental import pallas as pl
from jax.experimental.pallas import tpu as pltpu


# ---------------------------------------------------------------------------
# Shared head-column layout (pack order and host-side slicing must agree).
# ---------------------------------------------------------------------------
_HEAD_W_KEYS = ("w4", "w5", "w6")   # predictions, rewards, pred_states
_HEAD_B_KEYS = ("b4", "b5", "b6")


def _head_offsets(n_actions, input_dims):
    """Column offsets of (predictions, rewards, pred_states) in the fused head."""
    w4, w5, _ = n_actions, n_actions, n_actions * input_dims
    return 0, w4, w4 + w5


def _round_up(v, m):
    return -(-v // m) * m


# ---------------------------------------------------------------------------
# Pallas kernel: 3x (Linear + ReLU) trunk, one fused head matmul, one store.
# ---------------------------------------------------------------------------
def _make_kernel(number_unit, num_units_rep, head_pad):
    def kernel(x_ref, w1_ref, w2_ref, w3_ref, wh_ref, b_ref, out_ref):
        cd = w1_ref.dtype  # MXU operand dtype (bf16 perf path / f32 validation)

        b1 = b_ref[0:1, :number_unit]
        b2 = b_ref[1:2, :number_unit]
        b3 = b_ref[2:3, :num_units_rep]
        bh = b_ref[3:4, :head_pad]

        # In-kernel cast of the f32 state tile (cheap VPU work, hidden under matmuls).
        x = x_ref[...].astype(cd)

        # Trunk: fc1 -> relu -> fc2 -> relu -> fc3 -> relu.
        # f32 accumulation; bias-add / ReLU stay f32 (v5e has no bf16 VPU ops).
        h = jnp.dot(x, w1_ref[...], preferred_element_type=jnp.float32) + b1
        h = jnp.maximum(h, 0.0)
        h = jnp.dot(h.astype(cd), w2_ref[...], preferred_element_type=jnp.float32) + b2
        h = jnp.maximum(h, 0.0)
        h = jnp.dot(h.astype(cd), w3_ref[...], preferred_element_type=jnp.float32) + b3
        h = jnp.maximum(h, 0.0)

        # Fused heads [fc4 | fc5 | fc6] -> (tile_b, head_pad) in one MXU launch.
        heads = jnp.dot(h.astype(cd), wh_ref[...], preferred_element_type=jnp.float32) + bh

        # Single lane-dense store of the whole output slab: [heads | feats].
        out_ref[...] = jnp.concatenate([heads, h], axis=1).astype(out_ref.dtype)

    return kernel


# ---------------------------------------------------------------------------
# Host-side parameter packing (fuse head weights/biases, pad to 128 lanes).
# ---------------------------------------------------------------------------
def pack_params(params, compute_dtype=jnp.bfloat16):
    number_unit = params["w1"].shape[1]
    num_units_rep = params["w3"].shape[1]

    w_heads = jnp.concatenate([params[k] for k in _HEAD_W_KEYS], axis=1)
    b_heads = jnp.concatenate([params[k] for k in _HEAD_B_KEYS], axis=1)
    head_dim = w_heads.shape[1]
    head_pad = _round_up(head_dim, 128)
    if head_pad != head_dim:
        w_heads = jnp.pad(w_heads, ((0, 0), (0, head_pad - head_dim)))
        b_heads = jnp.pad(b_heads, ((0, 0), (0, head_pad - head_dim)))

    bias_w = max(number_unit, num_units_rep, head_pad)

    def padb(b):
        return jnp.pad(b, ((0, 0), (0, bias_w - b.shape[1])))

    b_all = jnp.concatenate(
        [padb(params["b1"]), padb(params["b2"]), padb(params["b3"]), padb(b_heads)],
        axis=0,
    ).astype(jnp.float32)  # biases stay f32 (added after f32 accumulation)

    return dict(
        w1=params["w1"].astype(compute_dtype),
        w2=params["w2"].astype(compute_dtype),
        w3=params["w3"].astype(compute_dtype),
        w_heads=w_heads.astype(compute_dtype),
        b_all=b_all,
    )


def _choose_tile_b(B):
    """Large tiles to amortize per-step overhead, but >= 2 grid steps when B allows
    so both v7x TensorCores get work (harmless on single-TC v5e/v6e)."""
    b8 = _round_up(B, 8)
    if b8 <= 8:
        return 8
    if b8 <= 1024:
        return _round_up(-(-b8 // 2), 8)   # ~half the batch per tile -> 2 steps
    return 512


# ---------------------------------------------------------------------------
# Forward pass
# ---------------------------------------------------------------------------
@partial(jax.jit, static_argnames=("n_actions", "input_dims", "out_dtype"))
def ttn_forward(state, w1, w2, w3, w_heads, b_all, *, n_actions, input_dims,
                out_dtype=jnp.float32):
    """state: (B, input_dims) f32.  Returns (predictions, features, pred_states, rewards)."""
    B, in_dim = state.shape
    assert in_dim == input_dims
    number_unit = w1.shape[1]
    num_units_rep = w3.shape[1]
    head_pad = w_heads.shape[1]
    out_w = head_pad + num_units_rep

    tile_b = _choose_tile_b(B)
    b_pad = _round_up(B, tile_b)

    x = state
    if b_pad != B:  # pad only when strictly required; no host-side dtype cast
        x = jnp.pad(x, ((0, b_pad - B), (0, 0)))

    kernel = _make_kernel(number_unit, num_units_rep, head_pad)

    wbytes = sum(int(a.size) * a.dtype.itemsize for a in (w1, w2, w3, w_heads, b_all))
    cost = pl.CostEstimate(
        flops=2 * b_pad * (input_dims * number_unit
                           + number_unit * number_unit
                           + number_unit * num_units_rep
                           + num_units_rep * head_pad),
        transcendentals=0,
        bytes_accessed=int(x.size) * x.dtype.itemsize
                       + wbytes
                       + b_pad * out_w * jnp.dtype(out_dtype).itemsize,
    )

    out = pl.pallas_call(
        kernel,
        out_shape=jax.ShapeDtypeStruct((b_pad, out_w), out_dtype),
        grid=(b_pad // tile_b,),
        in_specs=[
            pl.BlockSpec((tile_b, input_dims), lambda i: (i, 0)),   # state tile
            pl.BlockSpec(w1.shape, lambda i: (0, 0)),               # weights stay resident
            pl.BlockSpec(w2.shape, lambda i: (0, 0)),
            pl.BlockSpec(w3.shape, lambda i: (0, 0)),
            pl.BlockSpec(w_heads.shape, lambda i: (0, 0)),
            pl.BlockSpec(b_all.shape, lambda i: (0, 0)),
        ],
        out_specs=pl.BlockSpec((tile_b, out_w), lambda i: (i, 0)),
        compiler_params=pltpu.CompilerParams(
            dimension_semantics=("parallel",),  # shard batch tiles across TCs (v7x)
        ),
        cost_estimate=cost,
    )(x, w1, w2, w3, w_heads, b_all)

    heads = out[:B, :head_pad]
    feats = out[:B, head_pad:head_pad + num_units_rep]

    p_off, r_off, s_off = _head_offsets(n_actions, input_dims)
    predictions = heads[:, p_off:p_off + n_actions]
    rewards = heads[:, r_off:r_off + n_actions]
    pred_states = heads[:, s_off:s_off + n_actions * input_dims]
    return predictions, feats, pred_states, rewards


# ---------------------------------------------------------------------------
# Deterministic parameter init (mirrors the PyTorch module __init__)
# ---------------------------------------------------------------------------
def xavier_uniform(key, fan_in, fan_out):
    limit = jnp.sqrt(6.0 / (fan_in + fan_out))
    return jax.random.uniform(
        key, (fan_in, fan_out), dtype=jnp.float32, minval=-limit, maxval=limit
    )


def init_params(key, input_dims, n_actions, number_unit=128, num_units_rep=128):
    keys = jax.random.split(key, 7)
    return {
        "w1": xavier_uniform(keys[0], input_dims, number_unit),
        "b1": jnp.zeros((1, number_unit), jnp.float32),
        "w2": xavier_uniform(keys[1], number_unit, number_unit),
        "b2": jnp.zeros((1, number_unit), jnp.float32),
        "w3": xavier_uniform(keys[2], number_unit, num_units_rep),
        "b3": jnp.zeros((1, num_units_rep), jnp.float32),
        "w4": xavier_uniform(keys[3], num_units_rep, n_actions),
        "b4": jnp.zeros((1, n_actions), jnp.float32),
        "w5": xavier_uniform(keys[4], num_units_rep, n_actions),
        "b5": jnp.zeros((1, n_actions), jnp.float32),
        "w6": xavier_uniform(keys[5], num_units_rep, n_actions * input_dims),
        # fc6.bias is NOT zeroed in the PyTorch module: default U(-1/sqrt(fan_in), +)
        "b6": jax.random.uniform(
            keys[6],
            (1, n_actions * input_dims),
            dtype=jnp.float32,
            minval=-1.0 / jnp.sqrt(num_units_rep),
            maxval=1.0 / jnp.sqrt(num_units_rep),
        ),
    }


def reference_forward(state, p):
    relu = lambda z: jnp.maximum(z, 0.0)
    h = relu(state @ p["w1"] + p["b1"])
    h = relu(h @ p["w2"] + p["b2"])
    h = relu(h @ p["w3"] + p["b3"])
    return (h @ p["w4"] + p["b4"], h, h @ p["w6"] + p["b6"], h @ p["w5"] + p["b5"])


if __name__ == "__main__":
    key = jax.random.PRNGKey(0)
    k_param, k_state = jax.random.split(key)

    B = 256
    input_dims = 16
    n_actions = 4
    number_unit = 128
    num_units_rep = 128

    params = init_params(k_param, input_dims, n_actions, number_unit, num_units_rep)
    state = jax.random.normal(k_state, (B, input_dims), dtype=jnp.float32)

    refs = reference_forward(state, params)

    # --- f32 path: exact check against the pure-JAX reference -------------
    p32 = pack_params(params, jnp.float32)
    out32 = ttn_forward(
        state, p32["w1"], p32["w2"], p32["w3"], p32["w_heads"], p32["b_all"],
        n_actions=n_actions, input_dims=input_dims, out_dtype=jnp.float32,
    )
    jax.block_until_ready(out32)
    for got, ref in zip(out32, refs):
        assert got.shape == ref.shape, (got.shape, ref.shape)
        assert bool(jnp.allclose(got, ref, atol=1e-4, rtol=1e-4)), float(
            jnp.max(jnp.abs(got - ref))
        )

    # --- f32 path with a non-divisible batch (exercises padding + slicing) --
    Bo = 50
    state_odd = state[:Bo]
    refs_odd = reference_forward(state_odd, params)
    out_odd = ttn_forward(
        state_odd, p32["w1"], p32["w2"], p32["w3"], p32["w_heads"], p32["b_all"],
        n_actions=n_actions, input_dims=input_dims, out_dtype=jnp.float32,
    )
    jax.block_until_ready(out_odd)
    for got, ref in zip(out_odd, refs_odd):
        assert got.shape == ref.shape, (got.shape, ref.shape)
        assert bool(jnp.allclose(got, ref, atol=1e-4, rtol=1e-4)), float(
            jnp.max(jnp.abs(got - ref))
        )

    # --- bf16 perf path (bf16 MXU operands + bf16 output writeback) --------
    p16 = pack_params(params, jnp.bfloat16)
    out16 = ttn_forward(
        state, p16["w1"], p16["w2"], p16["w3"], p16["w_heads"], p16["b_all"],
        n_actions=n_actions, input_dims=input_dims, out_dtype=jnp.bfloat16,
    )
    jax.block_until_ready(out16)
    for got, ref in zip(out16, refs):
        assert got.shape == ref.shape, (got.shape, ref.shape)
        got32 = got.astype(jnp.float32)
        assert bool(jnp.allclose(got32, ref, atol=7.5e-2, rtol=7.5e-2)), float(
            jnp.max(jnp.abs(got32 - ref))
        )

    # shape sanity (matches the PyTorch module return order)
    preds, feats, pred_states, rewards = out16
    assert preds.shape == (B, n_actions)
    assert feats.shape == (B, num_units_rep)
    assert pred_states.shape == (B, n_actions * input_dims)
    assert rewards.shape == (B, n_actions)

    print("KERNEL_OK")
</pallas_src>

<mosaic_0001>
module attributes {stable_mosaic.version = 11 : i64} {
  func.func @kernel(%arg0: i32, %arg1: memref<128x16xf32, #tpu.memory_space<vmem>>, %arg2: memref<16x128xf32, #tpu.memory_space<vmem>>, %arg3: memref<128x128xf32, #tpu.memory_space<vmem>>, %arg4: memref<128x128xf32, #tpu.memory_space<vmem>>, %arg5: memref<128x128xf32, #tpu.memory_space<vmem>>, %arg6: memref<4x128xf32, #tpu.memory_space<vmem>>, %arg7: memref<128x256xf32, #tpu.memory_space<vmem>>) attributes {dimension_semantics = [#tpu.dimension_semantics<parallel>], iteration_bounds = array<i64: 2>, scalar_prefetch = 0 : i64, scratch_operands = 0 : i64, tpu.core_type = #tpu.core_type<tc>, window_params = [{transform_indices = @transform_0, window_bounds = array<i64: 128, 16>}, {pipeline_mode = #tpu.pipeline_mode<synchronous>, transform_indices = @transform_1, window_bounds = array<i64: 16, 128>}, {pipeline_mode = #tpu.pipeline_mode<synchronous>, transform_indices = @transform_2, window_bounds = array<i64: 128, 128>}, {pipeline_mode = #tpu.pipeline_mode<synchronous>, transform_indices = @transform_3, window_bounds = array<i64: 128, 128>}, {pipeline_mode = #tpu.pipeline_mode<synchronous>, transform_indices = @transform_4, window_bounds = array<i64: 128, 128>}, {pipeline_mode = #tpu.pipeline_mode<synchronous>, transform_indices = @transform_5, window_bounds = array<i64: 4, 128>}, {transform_indices = @transform_6, window_bounds = array<i64: 128, 256>}]} {
    %c0 = arith.constant 0 : index
    %c0_0 = arith.constant 0 : index
    %0 = vector.load %arg6[%c0, %c0_0] : memref<4x128xf32, #tpu.memory_space<vmem>>, vector<1x128xf32>
    %c1 = arith.constant 1 : index
    %c0_1 = arith.constant 0 : index
    %1 = vector.load %arg6[%c1, %c0_1] : memref<4x128xf32, #tpu.memory_space<vmem>>, vector<1x128xf32>
    %c2 = arith.constant 2 : index
    %c0_2 = arith.constant 0 : index
    %2 = vector.load %arg6[%c2, %c0_2] : memref<4x128xf32, #tpu.memory_space<vmem>>, vector<1x128xf32>
    %c3 = arith.constant 3 : index
    %c0_3 = arith.constant 0 : index
    %3 = vector.load %arg6[%c3, %c0_3] : memref<4x128xf32, #tpu.memory_space<vmem>>, vector<1x128xf32>
    %c0_4 = arith.constant 0 : index
    %c0_5 = arith.constant 0 : index
    %4 = vector.load %arg1[%c0_4, %c0_5] : memref<128x16xf32, #tpu.memory_space<vmem>>, vector<128x16xf32>
    %c0_6 = arith.constant 0 : index
    %c0_7 = arith.constant 0 : index
    %5 = vector.load %arg2[%c0_6, %c0_7] : memref<16x128xf32, #tpu.memory_space<vmem>>, vector<16x128xf32>
    %cst = arith.constant dense<0.000000e+00> : vector<128x128xf32>
    %6 = tpu.matmul %4, %5, %cst {dimension_numbers = #tpu.dot_dimension_numbers<[1], [0], [0], [1], [0, 0, 1, 1], [], []>} : vector<128x16xf32>, vector<16x128xf32>, vector<128x128xf32> -> vector<128x128xf32>
    %7 = vector.broadcast %0 : vector<1x128xf32> to vector<128x128xf32>
    %8 = arith.addf %6, %7 : vector<128x128xf32>
    %cst_8 = arith.constant 0.000000e+00 : f32
    %9 = vector.broadcast %cst_8 : f32 to vector<128x128xf32>
    %10 = arith.maximumf %8, %9 : vector<128x128xf32>
    %c0_9 = arith.constant 0 : index
    %c0_10 = arith.constant 0 : index
    %11 = vector.load %arg3[%c0_9, %c0_10] : memref<128x128xf32, #tpu.memory_space<vmem>>, vector<128x128xf32>
    %cst_11 = arith.constant dense<0.000000e+00> : vector<128x128xf32>
    %12 = tpu.matmul %10, %11, %cst_11 {dimension_numbers = #tpu.dot_dimension_numbers<[1], [0], [0], [1], [0, 0, 1, 1], [], []>} : vector<128x128xf32>, vector<128x128xf32>, vector<128x128xf32> -> vector<128x128xf32>
    %13 = vector.broadcast %1 : vector<1x128xf32> to vector<128x128xf32>
    %14 = arith.addf %12, %13 : vector<128x128xf32>
    %cst_12 = arith.constant 0.000000e+00 : f32
    %15 = vector.broadcast %cst_12 : f32 to vector<128x128xf32>
    %16 = arith.maximumf %14, %15 : vector<128x128xf32>
    %c0_13 = arith.constant 0 : index
    %c0_14 = arith.constant 0 : index
    %17 = vector.load %arg4[%c0_13, %c0_14] : memref<128x128xf32, #tpu.memory_space<vmem>>, vector<128x128xf32>
    %cst_15 = arith.constant dense<0.000000e+00> : vector<128x128xf32>
    %18 = tpu.matmul %16, %17, %cst_15 {dimension_numbers = #tpu.dot_dimension_numbers<[1], [0], [0], [1], [0, 0, 1, 1], [], []>} : vector<128x128xf32>, vector<128x128xf32>, vector<128x128xf32> -> vector<128x128xf32>
    %19 = vector.broadcast %2 : vector<1x128xf32> to vector<128x128xf32>
    %20 = arith.addf %18, %19 : vector<128x128xf32>
    %cst_16 = arith.constant 0.000000e+00 : f32
    %21 = vector.broadcast %cst_16 : f32 to vector<128x128xf32>
    %22 = arith.maximumf %20, %21 : vector<128x128xf32>
    %c0_17 = arith.constant 0 : index
    %c0_18 = arith.constant 0 : index
    %23 = vector.load %arg5[%c0_17, %c0_18] : memref<128x128xf32, #tpu.memory_space<vmem>>, vector<128x128xf32>
    %cst_19 = arith.constant dense<0.000000e+00> : vector<128x128xf32>
    %24 = tpu.matmul %22, %23, %cst_19 {dimension_numbers = #tpu.dot_dimension_numbers<[1], [0], [0], [1], [0, 0, 1, 1], [], []>} : vector<128x128xf32>, vector<128x128xf32>, vector<128x128xf32> -> vector<128x128xf32>
    %25 = vector.broadcast %3 : vector<1x128xf32> to vector<128x128xf32>
    %26 = arith.addf %24, %25 : vector<128x128xf32>
    %27 = tpu.concatenate %26, %22 in 1 : vector<128x128xf32>, vector<128x128xf32> -> vector<128x256xf32>
    %c0_20 = arith.constant 0 : index
    %c0_21 = arith.constant 0 : index
    %28 = vector.load %arg7[%c0_20, %c0_21] : memref<128x256xf32, #tpu.memory_space<vmem>>, vector<128x256xf32>
    tpu.vector_store %arg7[%c0_20, %c0_21], %27 {strides = array<i32>} : memref<128x256xf32, #tpu.memory_space<vmem>>, vector<128x256xf32>,
    return
  }
  func.func @transform_0(%arg0: i32) -> (i32, i32) {
    %c0_i32 = arith.constant 0 : i32
    %c0_i32_0 = arith.constant 0 : i32
    return %arg0, %c0_i32 : i32, i32
  }
  func.func @transform_1(%arg0: i32) -> (i32, i32) {
    %c0_i32 = arith.constant 0 : i32
    %c0_i32_0 = arith.constant 0 : i32
    %c0_i32_1 = arith.constant 0 : i32
    return %c0_i32, %c0_i32_0 : i32, i32
  }
  func.func @transform_2(%arg0: i32) -> (i32, i32) {
    %c0_i32 = arith.constant 0 : i32
    %c0_i32_0 = arith.constant 0 : i32
    %c0_i32_1 = arith.constant 0 : i32
    return %c0_i32, %c0_i32_0 : i32, i32
  }
  func.func @transform_3(%arg0: i32) -> (i32, i32) {
    %c0_i32 = arith.constant 0 : i32
    %c0_i32_0 = arith.constant 0 : i32
    %c0_i32_1 = arith.constant 0 : i32
    return %c0_i32, %c0_i32_0 : i32, i32
  }
  func.func @transform_4(%arg0: i32) -> (i32, i32) {
    %c0_i32 = arith.constant 0 : i32
    %c0_i32_0 = arith.constant 0 : i32
    %c0_i32_1 = arith.constant 0 : i32
    return %c0_i32, %c0_i32_0 : i32, i32
  }
  func.func @transform_5(%arg0: i32) -> (i32, i32) {
    %c0_i32 = arith.constant 0 : i32
    %c0_i32_0 = arith.constant 0 : i32
    %c0_i32_1 = arith.constant 0 : i32
    return %c0_i32, %c0_i32_0 : i32, i32
  }
  func.func @transform_6(%arg0: i32) -> (i32, i32) {
    %c0_i32 = arith.constant 0 : i32
    %c0_i32_0 = arith.constant 0 : i32
    return %arg0, %c0_i32 : i32, i32
  }
}

</mosaic_0001>

<bundles_post_ra>
// kernel: ttn_forward.1
= control target key start
LH: loop header
LB: loop body
LE: loop exit
PB: predicated region body
PF: predicated region fallthrough
CT: control target
= control target key end

     0   :  { %11 = vsyncpa [#allocation3], 0  ;;  %s1697_s21 = smov 0   ;;  %s2002_s0 = inlined_call_operand.vmem [shape: f32[256,16], index: 0, kind: input, shape index: {}]   ;;  %s2003_s1 = inlined_call_operand.vmem [shape: f32[16,128], index: 1, kind: input, shape index: {}]   ;;  %s2004_s2 = inlined_call_operand.vmem [shape: f32[128,128], index: 2, kind: input, shape index: {}]   ;;  %s2005_s3 = inlined_call_operand.vmem [shape: f32[128,128], index: 3, kind: input, shape index: {}]   ;;  %s2006_s4 = inlined_call_operand.hbm [shape: f32[128,128], index: 4, kind: input, shape index: {}]   ;;  %s2007_s5 = inlined_call_operand.vmem [shape: f32[4,128], index: 5, kind: input, shape index: {}]   ;;  %s2008_s6 = inlined_call_operand.vmem [shape: f32[256,256], index: 6, kind: output, shape index: {}]  }
   0x1 LB: > { %s1137_s22 = sadd.s32 4294967295, %s1657_s21   ;;  %p1139_p0 = scmp.ge.s32.totalorder %s1657_s21, 1  ;;  %s1657_s21 = sphi %s1697_s21, %s17_s21  }
   0x2   : > { %p179_p1 = scmp.lt.s32.totalorder %s1657_s21, 3  ;;  %s1659_s23 = smov [#allocation2]  }
   0x3   : > { %s200_s24 = sshll.u32 %s1659_s23, 4  ;;  %p1711_p3 = scmp.eq.s32.totalorder %s1137_s22, 0  ;;  %s201_s24 = int_to_ptr.vmem [resolvable:$true] %s200_s24 }
   0x4   : > { %p1705_p2 = pnand %p1139_p0, %p179_p1  ;;  %s1619_s30 = scalar_lea.hbm %s2006_s4, 2048 }
   0x5   : > { %s2013_s26 = scalar_select %p1711_p3, 1, 0 }
   0x6   : > { %s2012_s25 = scalar_select %p1705_p2, 1, 0 }
   0x7   : > { %p1602_p4 = pneg %p1705_p2  ;;  %p1620_p6 = scmp.ne.s32.totalorder %s2006_s4, %s1619_s30 }
   0x8   : > { %p1626_p10 = scmp.lt.u32.totalorder %s1619_s30, %s2006_s4 }
   0x9   : > { %p1719_p5 = pnand %p1711_p3, %p1602_p4 }
   0xb   : > { %p1621_p7 = pneg %p1719_p5 }
   0xd   : > { %p1622_p8 = pnand %p1621_p7, %p1620_p6 }
   0xf   : > { %p1623_p9 = pneg %p1622_p8 }
  0x11   : > { %p1628_p11 = pnand %p1626_p10, %p1623_p9 }
  0x13   : > { %1631 = shalt.err (!%p1628_p11)
}
  0x14   : > { %s1632_s11 = scalar_lea.vmem %s201_s24, 2048  ;;  %p1640_p1 = scmp.lt.s32.totalorder %s201_s24, %s201_s24 }
  0x15   : > { %p1633_p12 = scmp.ne.s32.totalorder %s201_s24, %s1632_s11  ;;  %p1641_p4 = scmp.lt.s32.totalorder %s1632_s11, %s1632_s11 }
  0x17   : > { %p1635_p13 = pnand %p1633_p12, %p1621_p7  ;;  %p1642_p3 = por %p1641_p4, %p1640_p1 }
  0x19   : > { %p1636_p0 = pneg %p1635_p13 }
  0x1b   : > { %p1643_p2 = pnand %p1642_p3, %p1636_p0 }
  0x1d   : > { %1646 = shalt.err (!%p1643_p2)
}
  0x1e   : > { %s1660_s12 = smov 128   ;;  %s1661_s13 = smov 8  }
  0x1f   : > { %1605 = dma.hbm_to_vmem [thread:$0]  (!%p1719_p5), %s2006_s4, 2048, %s201_s24, [#allocation3], %s1660_s12, %s1660_s12, %s1661_s13  }
  0x20   : > { %p2015_p6 = scmp.ne.s32.totalorder %s2012_s25, 0 }
  0x21   : > { %p2016_p8 = scmp.ne.s32.totalorder (!%p2015_p6), %s2013_s26, 0 }
  0x22   : > { %228 = sbr.rel (%p2015_p6) target bundleno = 948 (0x3b4), region = 44 }
  0x29   : > { %1652 = dma.done.wait (%p2016_p8), [#allocation3], 2048  }
  0x2a   : > { %1654 = vsyncadd (%p2016_p8), [#allocation3], 4294965248  ;;  %s1144_s16 = sshll.u32 %s1137_s22, 4  ;;  %vm298_vm0 = vcmask 130048   ;;  %v292_v0 = vld [vmem:[%s2003_s1] sm:$0xff]  ;;  %v293_v1 = vld [vmem:[%s2003_s1 + $0x8] sm:$0xff] }
  0x2b   : > { %p260_p2 = scmp.lt.s32.totalorder %s1144_s16, 31  ;;  %v1482_v3 = vpack.c.bf16 %v293_v1, %v292_v0  ;;  %v508_v6 = vld [vmem:[%s2004_s2] sm:$0xff]  ;;  %v509_v7 = vld [vmem:[%s2004_s2 + $0x8] sm:$0xff]  ;;  %v510_v8 = vld [vmem:[%s2004_s2 + $0x10] sm:$0xff] }
  0x2c   : > { %v1486_v9 = vpack.c.bf16 %v509_v7, %v508_v6  ;;  %v511_v10 = vld [vmem:[%s2004_s2 + $0x18] sm:$0xff]  ;;  %v512_v13 = vld [vmem:[%s2004_s2 + $0x20] sm:$0xff]  ;;  %v513_v14 = vld [vmem:[%s2004_s2 + $0x28] sm:$0xff] }
  0x2d   : > { %s2018_s16 = smov (!%p260_p2, %s1144_s16), 31  ;;  %1483 = vmatprep.subr.bf16.mxu0 %v1482_v3  ;;  %v1490_v12 = vpack.c.bf16 %v511_v10, %v510_v8  ;;  %v1494_v16 = vpack.c.bf16 %v513_v14, %v512_v13  ;;  %v514_v18 = vld [vmem:[%s2004_s2 + $0x30] sm:$0xff]  ;;  %v515_v19 = vld [vmem:[%s2004_s2 + $0x38] sm:$0xff]  ;;  %v516_v23 = vld [vmem:[%s2004_s2 + $0x40] sm:$0xff] }
  0x2e   : > { %s1145_s17 = sshll.u32 %s2018_s16, 3  ;;  %1485 = vmatpush3.bf16.msra.mxu0 %v1482_v3  ;;  %1487 = vmatprep.subr.bf16.mxu1 %v1486_v9  ;;  %v1498_v21 = vpack.c.bf16 %v515_v19, %v514_v18  ;;  %v517_v24 = vld [vmem:[%s2004_s2 + $0x48] sm:$0xff]  ;;  %v518_v28 = vld [vmem:[%s2004_s2 + $0x50] sm:$0xff]  ;;  %v519_v29 = vld [vmem:[%s2004_s2 + $0x58] sm:$0xff]  ;;  %s1171_s7 = sshll.u32 %s2018_s16, 4 }
  0x2f   : > { %s1753_s20 = scalar_lea.vmem %s2002_s0, %s1145_s17  ;;  %1489 = vmatpush3.bf16.msra.mxu1 %v1486_v9  ;;  %v1502_v26 = vpack.c.bf16 %v517_v24, %v516_v23  ;;  %v1506_v31 = vpack.c.bf16 %v519_v29, %v518_v28  ;;  %v520_v33 = vld [vmem:[%s2004_s2 + $0x60] sm:$0xff]  ;;  %v521_v34 = vld [vmem:[%s2004_s2 + $0x68] sm:$0xff]  ;;  %v522_v40 = vld [vmem:[%s2004_s2 + $0x70] sm:$0xff]  ;;  %s1947_s10 = scalar_lea.vmem %s2008_s6, %s1171_s7 }
  0x30   : > { %v276_v2 = vld [vmem:[%s1753_s20] sm:$0xff]  ;;  %v277_v4 = vld [vmem:[%s1753_s20 + $0x8] sm:$0xff]  ;;  %v278_v5 = vld [vmem:[%s1753_s20 + $0x10] sm:$0xff]  ;;  %1491 = vmatprep.subr.bf16.mxu1 %v1490_v12  ;;  %v1510_v36 = vpack.c.bf16 %v521_v34, %v520_v33 }
  0x31   : > { %1290 = vmatprep.mubr.msk.f32.mxu0 %vm298_vm0, %v276_v2  ;;  %v279_v11 = vld [vmem:[%s1753_s20 + $0x18] sm:$0xff]  ;;  %v280_v15 = vld [vmem:[%s1753_s20 + $0x20] sm:$0xff]  ;;  %v281_v17 = vld [vmem:[%s1753_s20 + $0x28] sm:$0xff] }
  0x32   : > { %1291 = vmatmul.mubr.msk.f32.vlgmr.msra.gmra.mrb[0].mxu0 %vm298_vm0, %v277_v4  ;;  %v282_v20 = vld [vmem:[%s1753_s20 + $0x30] sm:$0xff]  ;;  %v283_v22 = vld [vmem:[%s1753_s20 + $0x38] sm:$0xff]  ;;  %v284_v25 = vld [vmem:[%s1753_s20 + $0x40] sm:$0xff] }
  0x33   : > { %1293 = vmatprep.mubr.msk.f32.mxu0 %vm298_vm0, %v278_v5  ;;  %1493 = vmatpush3.bf16.msra.mxu1 %v1490_v12  ;;  %v285_v27 = vld [vmem:[%s1753_s20 + $0x48] sm:$0xff]  ;;  %v286_v30 = vld [vmem:[%s1753_s20 + $0x50] sm:$0xff]  ;;  %v287_v32 = vld [vmem:[%s1753_s20 + $0x58] sm:$0xff] }
  0x34   : > { %1495 = vmatprep.subr.bf16.mxu1 %v1494_v16  ;;  %v288_v35 = vld [vmem:[%s1753_s20 + $0x60] sm:$0xff]  ;;  %v289_v37 = vld [vmem:[%s1753_s20 + $0x68] sm:$0xff]  ;;  %v290_v38 = vld [vmem:[%s1753_s20 + $0x70] sm:$0xff] }
  0x35   : > { %v291_v39 = vld [vmem:[%s1753_s20 + $0x78] sm:$0xff]  ;;  %v689_v43 = vld [vmem:[%s2005_s3] sm:$0xff]  ;;  %v690_v44 = vld [vmem:[%s2005_s3 + $0x8] sm:$0xff] }
  0x36   : > { %1294 = vmatmul.mubr.msk.f32.gmra.mrb[2].mxu0 %vm298_vm0, %v279_v11  ;;  %v523_v41 = vld [vmem:[%s2004_s2 + $0x78] sm:$0xff]  ;;  %v691_v45 = vld [vmem:[%s2005_s3 + $0x10] sm:$0xff]  ;;  %v1518_v46 = vpack.c.bf16 %v690_v44, %v689_v43  ;;  %v693_v49 = vld [vmem:[%s2005_s3 + $0x20] sm:$0xff] }
  0x37   : > { %1296 = vmatprep.mubr.msk.f32.mxu0 %vm298_vm0, %v280_v15  ;;  %1497 = vmatpush3.bf16.msra.mxu1 %v1494_v16  ;;  %v1514_v42 = vpack.c.bf16 %v523_v41, %v522_v40  ;;  %v692_v47 = vld [vmem:[%s2005_s3 + $0x18] sm:$0xff]  ;;  %v694_v50 = vld [vmem:[%s2005_s3 + $0x28] sm:$0xff]  ;;  %v695_v52 = vld [vmem:[%s2005_s3 + $0x30] sm:$0xff] }
  0x38   : > { %1499 = vmatprep.subr.bf16.mxu1 %v1498_v21  ;;  %v1522_v48 = vpack.c.bf16 %v692_v47, %v691_v45  ;;  %1519 = vmatprep.subr.bf16.mxu0 %v1518_v46  ;;  %v1526_v51 = vpack.c.bf16 %v694_v50, %v693_v49  ;;  %v696_v53 = vld [vmem:[%s2005_s3 + $0x38] sm:$0xff]  ;;  %v697_v55 = vld [vmem:[%s2005_s3 + $0x40] sm:$0xff]  ;;  %v698_v56 = vld [vmem:[%s2005_s3 + $0x48] sm:$0xff] }
  0x39   : > { %1521 = vmatpush3.bf16.msra.mxu0 %v1518_v46  ;;  %v1530_v54 = vpack.c.bf16 %v696_v53, %v695_v52  ;;  %v1534_v57 = vpack.c.bf16 %v698_v56, %v697_v55  ;;  %v699_v58 = vld [vmem:[%s2005_s3 + $0x50] sm:$0xff]  ;;  %v700_v59 = vld [vmem:[%s2005_s3 + $0x58] sm:$0xff]  ;;  %v701_v61 = vld [vmem:[%s2005_s3 + $0x60] sm:$0xff] }
  0x3a   : > { %1297 = vmatmul.mubr.msk.f32.gmra.mrb[4].mxu0 %vm298_vm0, %v281_v17  ;;  %1523 = vmatprep.subr.bf16.mxu0 %v1522_v48  ;;  %v1538_v60 = vpack.c.bf16 %v700_v59, %v699_v58  ;;  %v702_v62 = vld [vmem:[%s2005_s3 + $0x68] sm:$0xff]  ;;  %v1149_v0 = vld [vmem:[%s2007_s5] ss:$0 sm:$0xff]  ;;  %v703_v49 = vld [vmem:[%s2005_s3 + $0x70] sm:$0xff] }
  0x3b   : > { %1299 = vmatprep.mubr.msk.f32.mxu0 %vm298_vm0, %v282_v20  ;;  %1501 = vmatpush3.bf16.msra.mxu1 %v1498_v21  ;;  %v1542_v63 = vpack.c.bf16 %v702_v62, %v701_v61  ;;  %v704_v50 = vld [vmem:[%s2005_s3 + $0x78] sm:$0xff]  ;;  %v870_v52 = vld [vmem:[#allocation2] sm:$0xff]  ;;  %v871_v53 = vld [vmem:[#allocation2 + $0x8] sm:$0xff] }
  0x3c   : > { %1503 = vmatprep.subr.bf16.mxu1 %v1502_v26  ;;  %v1550_v55 = vpack.c.bf16 %v871_v53, %v870_v52  ;;  %v873_v56 = vld [vmem:[#allocation2 + $0x18] sm:$0xff]  ;;  %v874_v58 = vld [vmem:[#allocation2 + $0x20] sm:$0xff]  ;;  %v875_v59 = vld [vmem:[#allocation2 + $0x28] sm:$0xff] }
  0x3d   : > { %1525 = vmatpush3.bf16.msra.mxu0 %v1522_v48  ;;  %v876_v61 = vld [vmem:[#allocation2 + $0x30] sm:$0xff]  ;;  %v877_v62 = vld [vmem:[#allocation2 + $0x38] sm:$0xff] }
  0x3e   : > { %1300 = vmatmul.mubr.msk.f32.gmra.mrb[6].mxu0 %vm298_vm0, %v283_v22  ;;  %1527 = vmatprep.subr.bf16.mxu0 %v1526_v51 }
  0x3f   : > { %1302 = vmatprep.mubr.msk.f32.mxu0 %vm298_vm0, %v284_v25  ;;  %1505 = vmatpush3.bf16.msra.mxu1 %v1502_v26 }
  0x40   : > { %1507 = vmatprep.subr.bf16.mxu1 %v1506_v31 }
  0x41   : > { %1529 = vmatpush3.bf16.msra.mxu0 %v1526_v51  ;;  %v1546_v51 = vpack.c.bf16 %v704_v50, %v703_v49 }
  0x42   : > { %1303 = vmatmul.mubr.msk.f32.gmra.mrb[8].mxu0 %vm298_vm0, %v285_v27  ;;  %1531 = vmatprep.subr.bf16.mxu0 %v1530_v54 }
  0x43   : > { %1305 = vmatprep.mubr.msk.f32.mxu0 %vm298_vm0, %v286_v30  ;;  %1509 = vmatpush3.bf16.msra.mxu1 %v1506_v31 }
  0x44   : > { %1511 = vmatprep.subr.bf16.mxu1 %v1510_v36 }
  0x45   : > { %1533 = vmatpush3.bf16.msra.mxu0 %v1530_v54  ;;  %v872_v54 = vld [vmem:[#allocation2 + $0x10] sm:$0xff] }
  0x46   : > { %1306 = vmatmul.mubr.msk.f32.gmra.mrb[10].mxu0 %vm298_vm0, %v287_v32  ;;  %1535 = vmatprep.subr.bf16.mxu0 %v1534_v57 }
  0x47   : > { %1308 = vmatprep.mubr.msk.f32.mxu0 %vm298_vm0, %v288_v35  ;;  %1513 = vmatpush3.bf16.msra.mxu1 %v1510_v36 }
  0x48   : > { %1515 = vmatprep.subr.bf16.mxu1 %v1514_v42 }
  0x49   : > { %1537 = vmatpush3.bf16.msra.mxu0 %v1534_v57  ;;  %v1554_v57 = vpack.c.bf16 %v873_v56, %v872_v54 }
  0x4a   : > { %1309 = vmatmul.mubr.msk.f32.gmra.mrb[12].mxu0 %vm298_vm0, %v289_v37  ;;  %1539 = vmatprep.subr.bf16.mxu0 %v1538_v60 }
  0x4b   : > { %1311 = vmatprep.mubr.msk.f32.mxu0 %vm298_vm0, %v290_v38  ;;  %1517 = vmatpush3.bf16.msra.mxu1 %v1514_v42 }
  0x4c   : > { %1582 = vmatprep.subr.bf16.mxu1 %v1550_v55 }
  0x4d   : > { %1541 = vmatpush3.bf16.msra.mxu0 %v1538_v60  ;;  %v1558_v60 = vpack.c.bf16 %v875_v59, %v874_v58  ;;  %v884_v58 = vld [vmem:[#allocation2 + $0x70] sm:$0xff]  ;;  %v885_v59 = vld [vmem:[#allocation2 + $0x78] sm:$0xff] }
  0x4e   : > { %1312 = vmatmul.mubr.msk.f32.gmra.mrb[14].mxu0 %vm298_vm0, %v291_v39  ;;  %1543 = vmatprep.subr.bf16.mxu0 %v1542_v63 }
  0x51   : > { %1545 = vmatpush3.bf16.msra.mxu0 %v1542_v63  ;;  %v1892_v63 = vpack.c.bf16 %v877_v62, %v876_v61  ;;  %v1940_v61 = vld [vmem:[%s2007_s5 + $0x2] ss:$0 sm:$0xff] }
  0x52   : > { %1547 = vmatprep.subr.bf16.mxu0 %v1546_v51 }
  0x55   : > { %1549 = vmatpush3.bf16.msra.mxu0 %v1546_v51 }
  0x56   : > { %1551 = vmatprep.subr.bf16.mxu0 %v1550_v55 }
 0x105   : > { %v1292_v1 = vpop.f32.mrb[0].mxu0 }
 0x106   : > { %v419_v2 = vadd.f32 %v1292_v1, %v1149_v0  ;;  %v413_v3 = vpop.f32.mrb[1].mxu0  ;;  %v879_v1 = vld [vmem:[#allocation2 + $0x48] sm:$0xff] }
 0x107   : > { %v414_v4 = vadd.f32 %v1149_v0, %v413_v3  ;;  %v880_v3 = vld [vmem:[#allocation2 + $0x50] sm:$0xff] }
 0x108   : > { %v493_v7 = vmax.f32 %v419_v2, 0.0 }
 0x109   : > { %v1295_v5 = vpop.f32.mrb[2].mxu0  ;;  %v492_v6 = vmax.f32 %v414_v4, 0.0  ;;  %v881_v4 = vld [vmem:[#allocation2 + $0x58] sm:$0xff] }
 0x10a   : > { %v429_v8 = vadd.f32 %v1295_v5, %v1149_v0  ;;  %v423_v9 = vpop.f32.mrb[3].mxu0  ;;  %v1899_v5 = vpack.c.bf16 %v881_v4, %v880_v3 }
 0x10b   : > { %v424_v10 = vadd.f32 %v1149_v0, %v423_v9  ;;  %1346 = vmatprep.mubr.f32.mxu1 %v492_v6  ;;  %v882_v6 = vld [vmem:[#allocation2 + $0x60] sm:$0xff] }
 0x10c   : > { %1347 = vmatmul.mubr.f32.vlgmr.msra.gmra.mrb[0].mxu1 %v493_v7  ;;  %v495_v13 = vmax.f32 %v429_v8, 0.0  ;;  %v883_v7 = vld [vmem:[#allocation2 + $0x68] sm:$0xff]  ;;  %v1911_v9 = vld [vmem:[%s2007_s5 + $0x1] ss:$0 sm:$0xff] }
 0x10d   : > { %v494_v11 = vmax.f32 %v424_v10, 0.0  ;;  %v1298_v12 = vpop.f32.mrb[4].mxu0  ;;  %1590 = vmatpush3.bf16.msra.mxu1 %v1550_v55  ;;  %v1903_v8 = vpack.c.bf16 %v883_v7, %v882_v6 }
 0x10e   : > { %v439_v14 = vadd.f32 %v1298_v12, %v1149_v0  ;;  %v433_v15 = vpop.f32.mrb[5].mxu0  ;;  %1583 = vmatprep.subr.bf16.mxu1 %v1554_v57 }
 0x10f   : > { %v434_v16 = vadd.f32 %v1149_v0, %v433_v15  ;;  %1349 = vmatprep.mubr.f32.mxu1 %v494_v11 }
 0x110   : > { %1350 = vmatmul.mubr.f32.gmra.mrb[2].mxu1 %v495_v13  ;;  %v497_v19 = vmax.f32 %v439_v14, 0.0 }
 0x111   : > { %v496_v17 = vmax.f32 %v434_v16, 0.0  ;;  %v1301_v18 = vpop.f32.mrb[6].mxu0  ;;  %1591 = vmatpush3.bf16.msra.mxu1 %v1554_v57 }
 0x112   : > { %v449_v20 = vadd.f32 %v1301_v18, %v1149_v0  ;;  %v443_v21 = vpop.f32.mrb[7].mxu0  ;;  %1584 = vmatprep.subr.bf16.mxu1 %v1558_v60 }
 0x113   : > { %v444_v22 = vadd.f32 %v1149_v0, %v443_v21  ;;  %1352 = vmatprep.mubr.f32.mxu1 %v496_v17 }
 0x114   : > { %1353 = vmatmul.mubr.f32.gmra.mrb[4].mxu1 %v497_v19  ;;  %v499_v25 = vmax.f32 %v449_v20, 0.0 }
 0x115   : > { %v498_v23 = vmax.f32 %v444_v22, 0.0  ;;  %v1304_v24 = vpop.f32.mrb[8].mxu0  ;;  %1592 = vmatpush3.bf16.msra.mxu1 %v1558_v60 }
 0x116   : > { %v459_v26 = vadd.f32 %v1304_v24, %v1149_v0  ;;  %v453_v27 = vpop.f32.mrb[9].mxu0  ;;  %1585 = vmatprep.subr.bf16.mxu1 %v1892_v63 }
 0x117   : > { %v454_v28 = vadd.f32 %v1149_v0, %v453_v27  ;;  %1355 = vmatprep.mubr.f32.mxu1 %v498_v23 }
 0x118   : > { %1356 = vmatmul.mubr.f32.gmra.mrb[6].mxu1 %v499_v25  ;;  %v501_v31 = vmax.f32 %v459_v26, 0.0 }
 0x119   : > { %v500_v29 = vmax.f32 %v454_v28, 0.0  ;;  %v1307_v30 = vpop.f32.mrb[10].mxu0  ;;  %1593 = vmatpush3.bf16.msra.mxu1 %v1892_v63 }
 0x11a   : > { %v469_v32 = vadd.f32 %v1307_v30, %v1149_v0  ;;  %v463_v33 = vpop.f32.mrb[11].mxu0 }
 0x11b   : > { %v464_v34 = vadd.f32 %v1149_v0, %v463_v33  ;;  %1358 = vmatprep.mubr.f32.mxu1 %v500_v29 }
 0x11c   : > { %1359 = vmatmul.mubr.f32.gmra.mrb[8].mxu1 %v501_v31  ;;  %v503_v37 = vmax.f32 %v469_v32, 0.0 }
 0x11d   : > { %v502_v35 = vmax.f32 %v464_v34, 0.0  ;;  %v1310_v36 = vpop.f32.mrb[12].mxu0 }
 0x11e   : > { %v479_v38 = vadd.f32 %v1310_v36, %v1149_v0  ;;  %v473_v39 = vpop.f32.mrb[13].mxu0 }
 0x11f   : > { %v474_v40 = vadd.f32 %v1149_v0, %v473_v39  ;;  %1361 = vmatprep.mubr.f32.mxu1 %v502_v35 }
 0x120   : > { %1362 = vmatmul.mubr.f32.gmra.mrb[10].mxu1 %v503_v37  ;;  %v505_v43 = vmax.f32 %v479_v38, 0.0 }
 0x121   : > { %v504_v41 = vmax.f32 %v474_v40, 0.0  ;;  %v1313_v42 = vpop.f32.mrb[14].mxu0 }
 0x122   : > { %v489_v44 = vadd.f32 %v1313_v42, %v1149_v0  ;;  %v483_v45 = vpop.f32.mrb[15].mxu0 }
 0x123   : > { %v484_v46 = vadd.f32 %v1149_v0, %v483_v45  ;;  %1364 = vmatprep.mubr.f32.mxu1 %v504_v41  ;;  %v878_v0 = vld [vmem:[#allocation2 + $0x40] sm:$0xff] }
 0x124   : > { %1365 = vmatmul.mubr.f32.gmra.mrb[12].mxu1 %v505_v43  ;;  %v507_v48 = vmax.f32 %v489_v44, 0.0  ;;  %v1895_v2 = vpack.c.bf16 %v879_v1, %v878_v0 }
 0x125   : > { %v506_v47 = vmax.f32 %v484_v46, 0.0 }
 0x126   : > { %1586 = vmatprep.subr.bf16.mxu1 %v1895_v2 }
 0x127   : > { %1367 = vmatprep.mubr.f32.mxu1 %v506_v47  ;;  %1594 = vmatpush3.bf16.msra.mxu1 %v1895_v2 }
 0x128   : > { %1368 = vmatmul.mubr.f32.gmra.mrb[14].mxu1 %v507_v48  ;;  %1587 = vmatprep.subr.bf16.mxu1 %v1899_v5 }
 0x12b   : > { %1595 = vmatpush3.bf16.msra.mxu1 %v1899_v5 }
 0x12c   : > { %1588 = vmatprep.subr.bf16.mxu1 %v1903_v8 }
 0x12f   : > { %1596 = vmatpush3.bf16.msra.mxu1 %v1903_v8 }
 0x1df   : > { %v1348_v10 = vpop.f32.mrb[0].mxu1 }
 0x1e0   : > { %v600_v11 = vadd.f32 %v1348_v10, %v1911_v9  ;;  %v594_v12 = vpop.f32.mrb[1].mxu1 }
 0x1e1   : > { %v595_v13 = vadd.f32 %v1911_v9, %v594_v12 }
 0x1e2   : > { %v674_v16 = vmax.f32 %v600_v11, 0.0 }
 0x1e3   : > { %v673_v14 = vmax.f32 %v595_v13, 0.0  ;;  %v1351_v15 = vpop.f32.mrb[2].mxu1 }
 0x1e4   : > { %v610_v17 = vadd.f32 %v1351_v15, %v1911_v9  ;;  %v604_v18 = vpop.f32.mrb[3].mxu1 }
 0x1e5   : > { %v605_v19 = vadd.f32 %v1911_v9, %v604_v18  ;;  %1402 = vmatprep.mubr.f32.mxu0 %v673_v14 }
 0x1e6   : > { %1403 = vmatmul.mubr.f32.vlgmr.msra.gmra.mrb[16].mxu0 %v674_v16  ;;  %v676_v22 = vmax.f32 %v610_v17, 0.0 }
 0x1e7   : > { %v675_v20 = vmax.f32 %v605_v19, 0.0  ;;  %v1354_v21 = vpop.f32.mrb[4].mxu1  ;;  %1553 = vmatpush3.bf16.msra.mxu0 %v1550_v55 }
 0x1e8   : > { %v620_v23 = vadd.f32 %v1354_v21, %v1911_v9  ;;  %v614_v24 = vpop.f32.mrb[5].mxu1  ;;  %1555 = vmatprep.subr.bf16.mxu0 %v1554_v57 }
 0x1e9   : > { %v615_v25 = vadd.f32 %v1911_v9, %v614_v24  ;;  %1405 = vmatprep.mubr.f32.mxu0 %v675_v20 }
 0x1ea   : > { %1406 = vmatmul.mubr.f32.gmra.mrb[18].mxu0 %v676_v22  ;;  %v678_v28 = vmax.f32 %v620_v23, 0.0 }
 0x1eb   : > { %v677_v26 = vmax.f32 %v615_v25, 0.0  ;;  %v1357_v27 = vpop.f32.mrb[6].mxu1  ;;  %1557 = vmatpush3.bf16.msra.mxu0 %v1554_v57 }
 0x1ec   : > { %v630_v29 = vadd.f32 %v1357_v27, %v1911_v9  ;;  %v624_v30 = vpop.f32.mrb[7].mxu1  ;;  %1559 = vmatprep.subr.bf16.mxu0 %v1558_v60 }
 0x1ed   : > { %v625_v31 = vadd.f32 %v1911_v9, %v624_v30  ;;  %1408 = vmatprep.mubr.f32.mxu0 %v677_v26 }
 0x1ee   : > { %1409 = vmatmul.mubr.f32.gmra.mrb[20].mxu0 %v678_v28  ;;  %v680_v34 = vmax.f32 %v630_v29, 0.0 }
 0x1ef   : > { %v679_v32 = vmax.f32 %v625_v31, 0.0  ;;  %v1360_v33 = vpop.f32.mrb[8].mxu1  ;;  %1561 = vmatpush3.bf16.msra.mxu0 %v1558_v60  ;;  %v1578_v60 = vpack.c.bf16 %v885_v59, %v884_v58 }
 0x1f0   : > { %v640_v35 = vadd.f32 %v1360_v33, %v1911_v9  ;;  %v634_v36 = vpop.f32.mrb[9].mxu1  ;;  %1563 = vmatprep.subr.bf16.mxu0 %v1892_v63 }
 0x1f1   : > { %v635_v37 = vadd.f32 %v1911_v9, %v634_v36  ;;  %1411 = vmatprep.mubr.f32.mxu0 %v679_v32  ;;  %1589 = vmatprep.subr.bf16.mxu1 %v1578_v60 }
 0x1f2   : > { %1412 = vmatmul.mubr.f32.gmra.mrb[22].mxu0 %v680_v34  ;;  %v682_v40 = vmax.f32 %v640_v35, 0.0  ;;  %1597 = vmatpush3.bf16.msra.mxu1 %v1578_v60 }
 0x1f3   : > { %v681_v38 = vmax.f32 %v635_v37, 0.0  ;;  %v1363_v39 = vpop.f32.mrb[10].mxu1  ;;  %1565 = vmatpush3.bf16.msra.mxu0 %v1892_v63 }
 0x1f4   : > { %v650_v41 = vadd.f32 %v1363_v39, %v1911_v9  ;;  %v644_v42 = vpop.f32.mrb[11].mxu1  ;;  %1567 = vmatprep.subr.bf16.mxu0 %v1895_v2 }
 0x1f5   : > { %v645_v43 = vadd.f32 %v1911_v9, %v644_v42  ;;  %1414 = vmatprep.mubr.f32.mxu0 %v681_v38 }
 0x1f6   : > { %1415 = vmatmul.mubr.f32.gmra.mrb[24].mxu0 %v682_v40  ;;  %v684_v46 = vmax.f32 %v650_v41, 0.0 }
 0x1f7   : > { %v683_v44 = vmax.f32 %v645_v43, 0.0  ;;  %v1366_v45 = vpop.f32.mrb[12].mxu1  ;;  %1569 = vmatpush3.bf16.msra.mxu0 %v1895_v2 }
 0x1f8   : > { %v660_v47 = vadd.f32 %v1366_v45, %v1911_v9  ;;  %v654_v48 = vpop.f32.mrb[13].mxu1  ;;  %1571 = vmatprep.subr.bf16.mxu0 %v1899_v5 }
 0x1f9   : > { %v655_v49 = vadd.f32 %v1911_v9, %v654_v48  ;;  %1417 = vmatprep.mubr.f32.mxu0 %v683_v44 }
 0x1fa   : > { %1418 = vmatmul.mubr.f32.gmra.mrb[26].mxu0 %v684_v46  ;;  %v686_v52 = vmax.f32 %v660_v47, 0.0  ;;  %v1168_v46 = vld [vmem:[%s2007_s5 + $0x3] ss:$0 sm:$0xff] }
 0x1fb   : > { %v685_v50 = vmax.f32 %v655_v49, 0.0  ;;  %v1369_v51 = vpop.f32.mrb[14].mxu1  ;;  %1573 = vmatpush3.bf16.msra.mxu0 %v1899_v5 }
 0x1fc   : > { %v670_v53 = vadd.f32 %v1369_v51, %v1911_v9  ;;  %v664_v54 = vpop.f32.mrb[15].mxu1  ;;  %1575 = vmatprep.subr.bf16.mxu0 %v1903_v8 }
 0x1fd   : > { %v665_v55 = vadd.f32 %v1911_v9, %v664_v54  ;;  %1420 = vmatprep.mubr.f32.mxu0 %v685_v50 }
 0x1fe   : > { %1421 = vmatmul.mubr.f32.gmra.mrb[28].mxu0 %v686_v52  ;;  %v688_v57 = vmax.f32 %v670_v53, 0.0 }
 0x1ff   : > { %v687_v56 = vmax.f32 %v665_v55, 0.0  ;;  %1577 = vmatpush3.bf16.msra.mxu0 %v1903_v8 }
 0x200   : > { %1579 = vmatprep.subr.bf16.mxu0 %v1578_v60 }
 0x201   : > { %1423 = vmatprep.mubr.f32.mxu0 %v687_v56 }
 0x202   : > { %1424 = vmatmul.mubr.f32.gmra.mrb[30].mxu0 %v688_v57 }
 0x203   : > { %1581 = vmatpush3.bf16.msra.mxu0 %v1578_v60 }
 0x2b9   : > { %v1404_v62 = vpop.f32.mrb[16].mxu0 }
 0x2ba   : > { %v781_v63 = vadd.f32 %v1404_v62, %v1940_v61  ;;  %v775_v0 = vpop.f32.mrb[17].mxu0 }
 0x2bb   : > { %v776_v1 = vadd.f32 %v1940_v61, %v775_v0 }
 0x2bc   : > { %v855_v2 = vmax.f32 %v781_v63, 0.0 }
 0x2bd   : > { %v854_v3 = vmax.f32 %v776_v1, 0.0  ;;  %v1407_v4 = vpop.f32.mrb[18].mxu0 }
 0x2be   : > { %1038 = vst [vmem:[%s1947_s10 + $0x18] sm:$0xff] %v855_v2  ;;  %v791_v5 = vadd.f32 %v1407_v4, %v1940_v61  ;;  %v785_v6 = vpop.f32.mrb[19].mxu0 }
 0x2bf   : > { %1036 = vst [vmem:[%s1947_s10 + $0x8] sm:$0xff] %v854_v3  ;;  %v786_v7 = vadd.f32 %v1940_v61, %v785_v6  ;;  %1458 = vmatprep.mubr.f32.mxu0 %v854_v3 }
 0x2c0   : > { %v857_v8 = vmax.f32 %v791_v5, 0.0  ;;  %1459 = vmatmul.mubr.f32.vlgmr.msra.gmra.mrb[32].mxu0 %v855_v2 }
 0x2c1   : > { %v856_v9 = vmax.f32 %v786_v7, 0.0  ;;  %v1410_v10 = vpop.f32.mrb[20].mxu0 }
 0x2c2   : > { %1042 = vst [vmem:[%s1947_s10 + $0x38] sm:$0xff] %v857_v8  ;;  %v801_v11 = vadd.f32 %v1410_v10, %v1940_v61  ;;  %v795_v12 = vpop.f32.mrb[21].mxu0 }
 0x2c3   : > { %1040 = vst [vmem:[%s1947_s10 + $0x28] sm:$0xff] %v856_v9  ;;  %v796_v13 = vadd.f32 %v1940_v61, %v795_v12  ;;  %1461 = vmatprep.mubr.f32.mxu0 %v856_v9 }
 0x2c4   : > { %v859_v14 = vmax.f32 %v801_v11, 0.0  ;;  %1462 = vmatmul.mubr.f32.gmra.mrb[34].mxu0 %v857_v8 }
 0x2c5   : > { %v858_v15 = vmax.f32 %v796_v13, 0.0  ;;  %v1413_v16 = vpop.f32.mrb[22].mxu0 }
 0x2c6   : > { %1046 = vst [vmem:[%s1947_s10 + $0x58] sm:$0xff] %v859_v14  ;;  %v811_v17 = vadd.f32 %v1413_v16, %v1940_v61  ;;  %v805_v18 = vpop.f32.mrb[23].mxu0 }
 0x2c7   : > { %1044 = vst [vmem:[%s1947_s10 + $0x48] sm:$0xff] %v858_v15  ;;  %v806_v19 = vadd.f32 %v1940_v61, %v805_v18  ;;  %1464 = vmatprep.mubr.f32.mxu0 %v858_v15 }
 0x2c8   : > { %v861_v20 = vmax.f32 %v811_v17, 0.0  ;;  %1465 = vmatmul.mubr.f32.gmra.mrb[36].mxu0 %v859_v14 }
 0x2c9   : > { %v860_v21 = vmax.f32 %v806_v19, 0.0  ;;  %v1416_v22 = vpop.f32.mrb[24].mxu0 }
 0x2ca   : > { %1050 = vst [vmem:[%s1947_s10 + $0x78] sm:$0xff] %v861_v20  ;;  %v821_v23 = vadd.f32 %v1416_v22, %v1940_v61  ;;  %v815_v24 = vpop.f32.mrb[25].mxu0 }
 0x2cb   : > { %1048 = vst [vmem:[%s1947_s10 + $0x68] sm:$0xff] %v860_v21  ;;  %v816_v25 = vadd.f32 %v1940_v61, %v815_v24  ;;  %1467 = vmatprep.mubr.f32.mxu1 %v860_v21 }
 0x2cc   : > { %v863_v26 = vmax.f32 %v821_v23, 0.0  ;;  %1468 = vmatmul.mubr.f32.vlgmr.msra.gmra.mrb[16].mxu1 %v861_v20 }
 0x2cd   : > { %v862_v27 = vmax.f32 %v816_v25, 0.0  ;;  %v1419_v28 = vpop.f32.mrb[26].mxu0 }
 0x2ce   : > { %1054 = vst [vmem:[%s1947_s10 + $0x98] sm:$0xff] %v863_v26  ;;  %v831_v29 = vadd.f32 %v1419_v28, %v1940_v61  ;;  %v825_v30 = vpop.f32.mrb[27].mxu0 }
 0x2cf   : > { %1052 = vst [vmem:[%s1947_s10 + $0x88] sm:$0xff] %v862_v27  ;;  %v826_v31 = vadd.f32 %v1940_v61, %v825_v30  ;;  %1470 = vmatprep.mubr.f32.mxu1 %v862_v27 }
 0x2d0   : > { %v865_v32 = vmax.f32 %v831_v29, 0.0  ;;  %1471 = vmatmul.mubr.f32.gmra.mrb[18].mxu1 %v863_v26 }
 0x2d1   : > { %v864_v33 = vmax.f32 %v826_v31, 0.0  ;;  %v1422_v34 = vpop.f32.mrb[28].mxu0 }
 0x2d2   : > { %1058 = vst [vmem:[%s1947_s10 + $0xb8] sm:$0xff] %v865_v32  ;;  %v841_v35 = vadd.f32 %v1422_v34, %v1940_v61  ;;  %v835_v36 = vpop.f32.mrb[29].mxu0 }
 0x2d3   : > { %1056 = vst [vmem:[%s1947_s10 + $0xa8] sm:$0xff] %v864_v33  ;;  %v836_v37 = vadd.f32 %v1940_v61, %v835_v36  ;;  %1473 = vmatprep.mubr.f32.mxu1 %v864_v33 }
 0x2d4   : > { %v867_v38 = vmax.f32 %v841_v35, 0.0  ;;  %1474 = vmatmul.mubr.f32.gmra.mrb[20].mxu1 %v865_v32 }
 0x2d5   : > { %v866_v39 = vmax.f32 %v836_v37, 0.0  ;;  %v1425_v40 = vpop.f32.mrb[30].mxu0 }
 0x2d6   : > { %1062 = vst [vmem:[%s1947_s10 + $0xd8] sm:$0xff] %v867_v38  ;;  %v851_v41 = vadd.f32 %v1425_v40, %v1940_v61  ;;  %v845_v42 = vpop.f32.mrb[31].mxu0 }
 0x2d7   : > { %1060 = vst [vmem:[%s1947_s10 + $0xc8] sm:$0xff] %v866_v39  ;;  %v846_v43 = vadd.f32 %v1940_v61, %v845_v42  ;;  %1476 = vmatprep.mubr.f32.mxu1 %v866_v39 }
 0x2d8   : > { %v869_v44 = vmax.f32 %v851_v41, 0.0  ;;  %1477 = vmatmul.mubr.f32.gmra.mrb[22].mxu1 %v867_v38 }
 0x2d9   : > { %v868_v45 = vmax.f32 %v846_v43, 0.0 }
 0x2da   : > { %1066 = vst [vmem:[%s1947_s10 + $0xf8] sm:$0xff] %v869_v44 }
 0x2db   : > { %1064 = vst [vmem:[%s1947_s10 + $0xe8] sm:$0xff] %v868_v45  ;;  %1479 = vmatprep.mubr.f32.mxu1 %v868_v45 }
 0x2dc   : > { %1480 = vmatmul.mubr.f32.gmra.mrb[24].mxu1 %v869_v44 }
 0x393   : > { %v1460_v47 = vpop.f32.mrb[32].mxu0 }
 0x394   : > { %v962_v48 = vadd.f32 %v1460_v47, %v1168_v46  ;;  %v956_v49 = vpop.f32.mrb[33].mxu0 }
 0x395   : > { %v957_v50 = vadd.f32 %v1168_v46, %v956_v49 }
 0x396   : > { %1037 = vst [vmem:[%s1947_s10 + $0x10] sm:$0xff] %v962_v48 }
 0x397   : > { %1035 = vst [vmem:[%s1947_s10] sm:$0xff] %v957_v50  ;;  %v1463_v51 = vpop.f32.mrb[34].mxu0 }
 0x398   : > { %v972_v52 = vadd.f32 %v1463_v51, %v1168_v46  ;;  %v966_v53 = vpop.f32.mrb[35].mxu0 }
 0x399   : > { %v967_v54 = vadd.f32 %v1168_v46, %v966_v53 }
 0x39a   : > { %1041 = vst [vmem:[%s1947_s10 + $0x30] sm:$0xff] %v972_v52 }
 0x39b   : > { %1039 = vst [vmem:[%s1947_s10 + $0x20] sm:$0xff] %v967_v54  ;;  %v1466_v55 = vpop.f32.mrb[36].mxu0 }
 0x39c   : > { %v982_v56 = vadd.f32 %v1466_v55, %v1168_v46  ;;  %v976_v57 = vpop.f32.mrb[37].mxu0 }
 0x39d   : > { %v977_v58 = vadd.f32 %v1168_v46, %v976_v57 }
 0x39e   : > { %1045 = vst [vmem:[%s1947_s10 + $0x50] sm:$0xff] %v982_v56 }
 0x39f   : > { %1043 = vst [vmem:[%s1947_s10 + $0x40] sm:$0xff] %v977_v58  ;;  %v1469_v59 = vpop.f32.mrb[16].mxu1 }
 0x3a0   : > { %v992_v60 = vadd.f32 %v1469_v59, %v1168_v46  ;;  %v986_v61 = vpop.f32.mrb[17].mxu1 }
 0x3a1   : > { %v987_v62 = vadd.f32 %v1168_v46, %v986_v61 }
 0x3a2   : > { %1049 = vst [vmem:[%s1947_s10 + $0x70] sm:$0xff] %v992_v60 }
 0x3a3   : > { %1047 = vst [vmem:[%s1947_s10 + $0x60] sm:$0xff] %v987_v62  ;;  %v1472_v63 = vpop.f32.mrb[18].mxu1 }
 0x3a4   : > { %v1002_v0 = vadd.f32 %v1472_v63, %v1168_v46  ;;  %v996_v1 = vpop.f32.mrb[19].mxu1 }
 0x3a5   : > { %v997_v2 = vadd.f32 %v1168_v46, %v996_v1 }
 0x3a6   : > { %1053 = vst [vmem:[%s1947_s10 + $0x90] sm:$0xff] %v1002_v0 }
 0x3a7   : > { %1051 = vst [vmem:[%s1947_s10 + $0x80] sm:$0xff] %v997_v2  ;;  %v1475_v3 = vpop.f32.mrb[20].mxu1 }
 0x3a8   : > { %v1012_v4 = vadd.f32 %v1475_v3, %v1168_v46  ;;  %v1006_v5 = vpop.f32.mrb[21].mxu1 }
 0x3a9   : > { %v1007_v6 = vadd.f32 %v1168_v46, %v1006_v5 }
 0x3aa   : > { %1057 = vst [vmem:[%s1947_s10 + $0xb0] sm:$0xff] %v1012_v4 }
 0x3ab   : > { %1055 = vst [vmem:[%s1947_s10 + $0xa0] sm:$0xff] %v1007_v6  ;;  %v1478_v7 = vpop.f32.mrb[22].mxu1 }
 0x3ac   : > { %v1022_v8 = vadd.f32 %v1478_v7, %v1168_v46  ;;  %v1016_v9 = vpop.f32.mrb[23].mxu1 }
 0x3ad   : > { %v1017_v10 = vadd.f32 %v1168_v46, %v1016_v9 }
 0x3ae   : > { %1061 = vst [vmem:[%s1947_s10 + $0xd0] sm:$0xff] %v1022_v8 }
 0x3af   : > { %1059 = vst [vmem:[%s1947_s10 + $0xc0] sm:$0xff] %v1017_v10  ;;  %v1481_v11 = vpop.f32.mrb[24].mxu1 }
 0x3b0   : > { %v1032_v12 = vadd.f32 %v1481_v11, %v1168_v46  ;;  %v1026_v13 = vpop.f32.mrb[25].mxu1 }
 0x3b1   : > { %v1027_v14 = vadd.f32 %v1168_v46, %v1026_v13 }
 0x3b2   : > { %1065 = vst [vmem:[%s1947_s10 + $0xf0] sm:$0xff] %v1032_v12 }
 0x3b3   : > { %1063 = vst [vmem:[%s1947_s10 + $0xe0] sm:$0xff] %v1027_v14 }
 0x3b4 PF: > { %s17_s21 = sadd.s32 1, %s1657_s21  }
 0x3b5   : > { %p14_p3 = scmp.ge.s32.totalorder %s17_s21, 4  }
 0x3b7   :  { %16 = sbr.rel (!%p14_p3) target bundleno = 1 (0x1), region = 79 }
 0x3be   :  { %1091 = vsyncpa [#allocation3], 1 }
 0x3bf   :  { %1093 = vsyncpa [#allocation3 + $0x1], 1 }

</bundles_post_ra>
